<compile_context>
chip_gen: v7x
topology: tpu7x:2x2x1
jax: 0.10.0
libtpu: 0.0.40
codegen_flags: <defaults>
</compile_context>

<pallas_src>
import math
import functools

import jax
import jax.numpy as jnp
from jax.experimental import pallas as pl
from jax.experimental.pallas import tpu as pltpu


# ----------------------------------------------------------------------------
# Buffer construction (plain JAX glue, matches the PyTorch module exactly)
# ----------------------------------------------------------------------------
def make_positional_encoding_table(d_model: int, max_len: int = 5000) -> jnp.ndarray:
    """(max_len, d_model) sin/cos table, identical to the PyTorch buffer."""
    position = jnp.arange(0, max_len, dtype=jnp.float32)[:, None]            # (max_len, 1)
    div_term = jnp.exp(
        jnp.arange(0, d_model, 2, dtype=jnp.float32) * (-math.log(10000.0) / d_model)
    )                                                                         # (d_model//2,)
    pe = jnp.zeros((max_len, d_model), dtype=jnp.float32)
    pe = pe.at[:, 0::2].set(jnp.sin(position * div_term))
    pe = pe.at[:, 1::2].set(jnp.cos(position * div_term))
    return pe


# ----------------------------------------------------------------------------
# Pallas kernels
# ----------------------------------------------------------------------------
def _pe_add_kernel(x_ref, pe_ref, o_ref):
    """Eval mode (dropout == identity): y = x + pe.

    x_ref: (TS, B, D) VMEM;  pe_ref: (TS, D) VMEM, broadcast over the batch axis.
    """
    pe = pe_ref[...][:, None, :]                       # (TS, 1, D) -> broadcasts to (TS, B, D)
    o_ref[...] = (x_ref[...] + pe).astype(o_ref.dtype)


def _pe_add_dropout_kernel(x_ref, bits_ref, pe_ref, o_ref, *, threshold: int, scale: float):
    """Train mode: y = dropout(x + pe) with keep prob (1-p), scale 1/(1-p).

    x_ref: (TS, B, D);  bits_ref: (TS, B, D) int32 uniform random bits;
    pe_ref: (TS, D).  keep iff bits >= threshold, where threshold = p*2^32 - 2^31
    (bits viewed as signed int32 are uniform on [-2^31, 2^31)) -> P(keep) = 1 - p
    at full 32-bit resolution with a single signed compare.
    """
    pe = pe_ref[...][:, None, :]
    y = x_ref[...] + pe                                # broadcast over batch axis
    keep = bits_ref[...] >= jnp.int32(threshold)
    o_ref[...] = jnp.where(keep, y * jnp.float32(scale), jnp.float32(0.0)).astype(o_ref.dtype)


# ----------------------------------------------------------------------------
# Wrapper
# ----------------------------------------------------------------------------
def positional_encoding_forward(x, pe_table, *, p: float = 0.1, train: bool = True,
                                rng_key=None, block_rows: int | None = None):
    """
    x:        (S, B, D) float32  (seq_len, batch, d_model) -- nn.Transformer layout
    pe_table: (max_len, D) float32 precomputed buffer (max_len >= S)
    Returns   (S, B, D) float32 == dropout(x + pe[:S])
    """
    S, B, D = x.shape
    pe_table = pe_table.astype(x.dtype)

    # Tile the sequence axis. Target ~4 MiB of x per step: with double-buffered
    # x + bits + out (+ the tiny (ts, D) pe stream) that is ~24-36 MiB of VMEM in
    # train mode, under the 48 MiB scoped limit set below on every generation,
    # while staying close to the measured HBM-roofline sweet spot (>=512-row /
    # multi-MiB blocks) and amortizing the ~0.35 us per-step overhead.
    if block_rows is None:
        bytes_per_row = B * D * x.dtype.itemsize
        block_rows = max(1, (4 * 1024 * 1024) // bytes_per_row)
    ts = int(max(1, min(S, block_rows)))
    grid = (pl.cdiv(S, ts),)

    x_spec = pl.BlockSpec((ts, B, D), lambda i: (i, 0, 0))
    # Lane-dense 2-D pe block straight from the (max_len, D) table: no size-1
    # second-minor dim, so no 8x sublane padding of the pe VMEM buffer.
    pe_spec = pl.BlockSpec((ts, D), lambda i: (i, 0))
    out_spec = pl.BlockSpec((ts, B, D), lambda i: (i, 0, 0))
    out_shape = jax.ShapeDtypeStruct((S, B, D), x.dtype)

    # Each sequence tile is independent -> shard across v7x's 2 TensorCores.
    # Raise the scoped VMEM limit explicitly; 48 MiB is safe on v5e/v6e (128 MiB
    # physical) and leaves headroom on v7x (64 MiB physical).
    cparams = pltpu.CompilerParams(
        dimension_semantics=("parallel",),
        vmem_limit_bytes=48 * 1024 * 1024,
    )

    if train and p > 0.0:
        if p >= 1.0:
            return jnp.zeros_like(x)
        if rng_key is None:
            rng_key = jax.random.PRNGKey(0)
        # Uniform 32-bit random bits, generated outside the kernel (the interpret
        # backend has no lowering for the TPU hardware PRNG primitives), viewed as
        # signed int32 so the in-kernel compare is a plain signed >=.
        bits_u32 = jax.random.bits(rng_key, x.shape, dtype=jnp.uint32)
        bits = jax.lax.bitcast_convert_type(bits_u32, jnp.int32)
        bits_spec = pl.BlockSpec((ts, B, D), lambda i: (i, 0, 0))

        threshold = int(round(float(p) * 4294967296.0)) - 2147483648   # p*2^32 - 2^31
        scale = 1.0 / (1.0 - float(p))

        return pl.pallas_call(
            functools.partial(_pe_add_dropout_kernel, threshold=threshold, scale=scale),
            out_shape=out_shape,
            grid=grid,
            in_specs=[x_spec, bits_spec, pe_spec],
            out_specs=out_spec,
            compiler_params=cparams,
        )(x, bits, pe_table)
    else:
        return pl.pallas_call(
            _pe_add_kernel,
            out_shape=out_shape,
            grid=grid,
            in_specs=[x_spec, pe_spec],
            out_specs=out_spec,
            compiler_params=cparams,
        )(x, pe_table)


# ----------------------------------------------------------------------------
# Main
# ----------------------------------------------------------------------------
if __name__ == "__main__":
    # Small but lane/sublane-friendly shapes: d_model multiple of 128, batch = 8.
    S, B, D = 64, 8, 128        # seq_len, batch, d_model
    p_drop = 0.1
    max_len = 5000

    key = jax.random.PRNGKey(0)
    x_key, drop_key = jax.random.split(key)
    x = jax.random.normal(x_key, (S, B, D), dtype=jnp.float32)
    pe_table = make_positional_encoding_table(D, max_len)
    ref = x + pe_table[:S][:, None, :]

    # Eval mode (dropout == identity): exact check vs. plain-JAX reference.
    # block_rows=16 forces a 4-step grid so the tiling path is exercised.
    y_eval = positional_encoding_forward(x, pe_table, p=p_drop, train=False,
                                         block_rows=16)
    y_eval = jax.block_until_ready(y_eval)
    assert jnp.allclose(y_eval, ref, atol=1e-5), "eval-mode mismatch"

    # Train mode: dropout applied inside the kernel (threshold compare + select).
    y_train = positional_encoding_forward(x, pe_table, p=p_drop, train=True,
                                          rng_key=drop_key, block_rows=16)
    y_train = jax.block_until_ready(y_train)
    assert y_train.shape == (S, B, D)
    # Kept elements must equal (x + pe) / (1 - p); dropped elements are exactly 0.
    kept = y_train != 0.0
    scale = 1.0 / (1.0 - p_drop)
    assert jnp.allclose(jnp.where(kept, y_train, 0.0),
                        jnp.where(kept, ref * scale, 0.0), atol=1e-4), "train-mode value mismatch"
    drop_rate = 1.0 - float(jnp.mean(kept.astype(jnp.float32)))
    assert 0.0 < drop_rate < 0.5, f"implausible dropout rate {drop_rate}"

    print("KERNEL_OK")
</pallas_src>

<mosaic_0001>
module attributes {stable_mosaic.version = 11 : i64} {
  func.func @_pe_add_kernel(%arg0: i32, %arg1: memref<16x8x128xf32, #tpu.memory_space<vmem>>, %arg2: memref<16x128xf32, #tpu.memory_space<vmem>>, %arg3: memref<16x8x128xf32, #tpu.memory_space<vmem>>) attributes {dimension_semantics = [#tpu.dimension_semantics<parallel>], iteration_bounds = array<i64: 4>, scalar_prefetch = 0 : i64, scratch_operands = 0 : i64, tpu.core_type = #tpu.core_type<tc>, window_params = [{transform_indices = @transform_0, window_bounds = array<i64: 16, 8, 128>}, {transform_indices = @transform_1, window_bounds = array<i64: 16, 128>}, {transform_indices = @transform_2, window_bounds = array<i64: 16, 8, 128>}]} {
    %c0 = arith.constant 0 : index
    %c0_0 = arith.constant 0 : index
    %0 = vector.load %arg2[%c0, %c0_0] : memref<16x128xf32, #tpu.memory_space<vmem>>, vector<16x128xf32>
    %1 = vector.shape_cast %0 : vector<16x128xf32> to vector<16x1x128xf32>
    %c0_1 = arith.constant 0 : index
    %c0_2 = arith.constant 0 : index
    %c0_3 = arith.constant 0 : index
    %2 = vector.load %arg1[%c0_1, %c0_2, %c0_3] : memref<16x8x128xf32, #tpu.memory_space<vmem>>, vector<16x8x128xf32>
    %3 = vector.broadcast %1 : vector<16x1x128xf32> to vector<16x8x128xf32>
    %4 = arith.addf %2, %3 : vector<16x8x128xf32>
    %c0_4 = arith.constant 0 : index
    %c0_5 = arith.constant 0 : index
    %c0_6 = arith.constant 0 : index
    %5 = vector.load %arg3[%c0_4, %c0_5, %c0_6] : memref<16x8x128xf32, #tpu.memory_space<vmem>>, vector<16x8x128xf32>
    tpu.vector_store %arg3[%c0_4, %c0_5, %c0_6], %4 {strides = array<i32>} : memref<16x8x128xf32, #tpu.memory_space<vmem>>, vector<16x8x128xf32>,
    return
  }
  func.func @transform_0(%arg0: i32) -> (i32, i32, i32) {
    %c0_i32 = arith.constant 0 : i32
    %c0_i32_0 = arith.constant 0 : i32
    %c0_i32_1 = arith.constant 0 : i32
    return %arg0, %c0_i32, %c0_i32_0 : i32, i32, i32
  }
  func.func @transform_1(%arg0: i32) -> (i32, i32) {
    %c0_i32 = arith.constant 0 : i32
    %c0_i32_0 = arith.constant 0 : i32
    return %arg0, %c0_i32 : i32, i32
  }
  func.func @transform_2(%arg0: i32) -> (i32, i32, i32) {
    %c0_i32 = arith.constant 0 : i32
    %c0_i32_0 = arith.constant 0 : i32
    %c0_i32_1 = arith.constant 0 : i32
    return %arg0, %c0_i32, %c0_i32_0 : i32, i32, i32
  }
}

</mosaic_0001>

<bundles_post_ra>
// kernel: tpu_custom_call.1
= control target key start
LH: loop header
LB: loop body
LE: loop exit
PB: predicated region body
PF: predicated region fallthrough
CT: control target
= control target key end

     0   :  { %7 = vsyncpa [#allocation3], 0  ;;  %s1061_s0 = inlined_call_operand.hbm [shape: f32[64,8,128], index: 0, kind: input, shape index: {}]   ;;  %s1062_s1 = inlined_call_operand.hbm [shape: f32[5000,128], index: 1, kind: input, shape index: {}]   ;;  %s1063_s2 = inlined_call_operand.hbm [shape: f32[64,8,128], index: 2, kind: output, shape index: {}]  }
   0x1   :  { %9 = vsyncpa [#allocation3 + $0x1], 0 }
   0x2   :  { %10 = vsyncpa [#allocation6], 0 }
   0x3   :  { %12 = vsyncpa [#allocation6 + $0x1], 0 }
   0x4   :  { %13 = vsyncpa [#allocation4], 0 }
   0x5   :  { %15 = vsyncpa [#allocation4 + $0x1], 0  ;;  %s784_s9 = smov 0   ;;  %s786_s10 = smov 0  }
   0x6   :  { %s788_s11 = smov 0   ;;  %s790_s12 = smov 0  }
   0x7 LB: > { %s805_s13 = sadd.s32 4294967295, %s757_s12   ;;  %s555_s14 = sadd.s32 4294967294, %s757_s12   ;;  %s757_s12 = sphi %s790_s12, %s1074_s12   ;;  %s753_s11 = sphi %s788_s11, %s1073_s11   ;;  %s749_s10 = sphi %s786_s10, %s1072_s10   ;;  %s745_s9 = sphi %s784_s9, %s1071_s9  }
   0x8   : > { %s809_s15 = sadd.s32 1, %s757_s12   ;;  %s28_s16 = sadd.s32 1, %s753_s11 }
   0x9   : > { %s25_s17 = ssub.s32 %s757_s12, %s809_s15  ;;  %p35_p0 = scmp.ne.s32.totalorder %s753_s11, %s749_s10 }
   0xa   : > { %p26_p1 = scmp.eq.s32.totalorder %s25_s17, 0  ;;  %p36_p2 = scmp.eq.s32.totalorder %s757_s12, 0 }
   0xb   : > { %p41_p3 = scmp.ne.s32.totalorder %s749_s10, %s745_s9  ;;  %p42_p4 = scmp.eq.s32.totalorder %s805_s13, 0 }
   0xc   : > { %s821_s18 = scalar_select %p26_p1, %s753_s11, %s28_s16  }
   0xd   : > { %p823_p5 = por %p36_p2, %p35_p0  ;;  %p827_p6 = por %p42_p4, %p41_p3 }
   0xe   : > { %p91_p7 = scmp.eq.s32.totalorder %s805_s13, 3  ;;  %p97_p8 = scmp.eq.s32.totalorder %s555_s14, 3 }
   0xf   : > { %p557_p11 = scmp.ge.s32.totalorder %s757_s12, 4 }
  0x10   : > { %p832_p9 = por %p91_p7, %p35_p0  ;;  %p836_p10 = por %p97_p8, %p41_p3 }
  0x11   : > { %113 = sbr.rel (%p557_p11) target bundleno = 81 (0x51), region = 16  ;;  %s842_s23 = sand.u32 (!%p557_p11), 1, %s753_s11  }
  0x12   : > { %s1067_s21 = scalar_select %p832_p9, 1, 0 }
  0x13   : > { %s1068_s22 = scalar_select %p836_p10, 1, 0 }
  0x14   : > { %s577_s24 = sshll.u32 (!%p557_p11), %s757_s12, 11  ;;  %s558_s25 = sshll.u32 (!%p557_p11), %s842_s23, 7 }
  0x15   : > { %s849_s28 = scalar_lea.hbm (!%p557_p11), %s1061_s0, %s577_s24  ;;  %s121_s29 = scalar_lea.vmem (!%p557_p11), [#allocation2], %s558_s25 }
  0x16   : > { %s128_s30 = sshll.u32 (!%p557_p11), %s121_s29, 4  ;;  %s118_s3 = scalar_lea.sflag (!%p557_p11), [#allocation3], %s842_s23  ;;  %s851_s30 = int_to_ptr.vmem [resolvable:$true] %s128_s30 }
  0x17   : > { %s631_s4 = scalar_lea.hbm (!%p557_p11), %s849_s28, 2048  ;;  %s635_s7 = scalar_lea.hbm (!%p557_p11), %s1061_s0, 8192 }
  0x18   : > { %p632_p12 = scmp.ne.s32.totalorder %s849_s28, %s631_s4  ;;  %p636_p1 = scmp.lt.u32.totalorder %s849_s28, %s1061_s0 }
  0x19   : > { %p637_p2 = scmp.lt.u32.totalorder %s635_s7, %s631_s4  ;;  %p639_p4 = scmp.lt.u32.totalorder %s631_s4, %s849_s28 }
  0x1a   : > { %p633_p13 = pnand %p632_p12, %p823_p5 }
  0x1b   : > { %p638_p3 = por %p637_p2, %p636_p1 }
  0x1c   : > { %p634_p0 = pneg %p633_p13 }
  0x1d   : > { %p640_p7 = por %p639_p4, %p638_p3 }
  0x1f   : > { %p641_p8 = pnand %p640_p7, %p634_p0 }
  0x21   : > { %644 = shalt.err (!%p641_p8)
}
  0x22   : > { %s645_s16 = scalar_lea.vmem %s851_s30, 2048  ;;  %s759_s17 = smov [#allocation2]  }
  0x23   : > { %p646_p11 = scmp.ne.s32.totalorder %s851_s30, %s645_s16  ;;  %s649_s24 = sshll.u32 %s759_s17, 4  ;;  %s650_s24 = int_to_ptr.vmem [resolvable:$false] %s649_s24 }
  0x24   : > { %s651_s25 = scalar_lea.vmem %s650_s24, 4096  ;;  %p652_p10 = scmp.lt.s32.totalorder %s851_s30, %s650_s24 }
  0x25   : > { %p647_p12 = pnand %p646_p11, %p823_p5  ;;  %p653_p9 = scmp.lt.s32.totalorder %s651_s25, %s645_s16 }
  0x27   : > { %p648_p13 = pneg %p647_p12  ;;  %p654_p1 = por %p653_p9, %p652_p10 }
  0x29   : > { %p655_p2 = pnand %p654_p1, %p648_p13 }
  0x2b   : > { %658 = shalt.err (!%p655_p2)
}
  0x2c   : > { %s760_s26 = smov 128   ;;  %s761_s27 = smov 8  }
  0x2d   : > { %580 = dma.hbm_to_vmem [thread:$0]  (%p823_p5), %s849_s28, 2048, %s851_s30, %s118_s3, %s760_s26, %s760_s26, %s761_s27  }
  0x2e   : > { %137 = sbr.rel (!%p823_p5) target bundleno = 81 (0x51), region = 24  ;;  %s561_s29 = sshll.u32 (%p823_p5), %s842_s23, 4 }
  0x2f   : > { %s562_s4 = sshll.u32 (%p823_p5), %s757_s12, 1  ;;  %s139_s8 = scalar_lea.sflag (%p823_p5), [#allocation6], %s842_s23 }
  0x30   : > { %s144_s5 = ssub.s32 (%p823_p5), 625, %s562_s4  ;;  %s142_s14 = scalar_lea.vmem (%p823_p5), [#allocation5], %s561_s29 }
  0x31   : > { %p145_p9 = scmp.lt.s32.totalorder (%p823_p5), %s144_s5, 2 }
  0x35   : > { %s1076_s5 = smov (!%p145_p9, %s144_s5), 2 }
  0x36   : > { %s881_s6 = sshll.u32 %s1076_s5, 7 }
  0x37   : > { %s149_s7 = ssub.s32 256, %s881_s6 }
  0x38   : > { %150 = vsyncadd %s139_s8, %s149_s7  ;;  %p564_p5 = scmp.ne.s32.totalorder %s881_s6, 0  ;;  %s578_s19 = sshll.u32 %s757_s12, 8 }
  0x39   : > { %s892_s3 = scalar_lea.hbm %s1062_s1, %s578_s19  ;;  %s155_s16 = sshll.u32 %s142_s14, 4  ;;  %s894_s16 = int_to_ptr.vmem [resolvable:$true] %s155_s16 }
  0x3a   : > { %s659_s17 = scalar_lea.hbm %s892_s3, %s881_s6  ;;  %s663_s26 = scalar_lea.hbm %s1062_s1, 80000 }
  0x3b   : > { %p660_p10 = scmp.ne.s32.totalorder %s892_s3, %s659_s17  ;;  %p664_p4 = scmp.lt.u32.totalorder %s892_s3, %s1062_s1 }
  0x3c   : > { %p665_p7 = scmp.lt.u32.totalorder %s663_s26, %s659_s17  ;;  %p667_p11 = scmp.lt.u32.totalorder %s659_s17, %s892_s3 }
  0x3d   : > { %p661_p0 = pnand %p660_p10, %p564_p5 }
  0x3e   : > { %p666_p8 = por %p665_p7, %p664_p4 }
  0x3f   : > { %p662_p3 = pneg %p661_p0 }
  0x40   : > { %p668_p12 = por %p667_p11, %p666_p8 }
  0x42   : > { %p669_p13 = pnand %p668_p12, %p662_p3 }
  0x44   : > { %672 = shalt.err (!%p669_p13)
}
  0x45   : > { %s673_s4 = scalar_lea.vmem %s894_s16, %s881_s6  ;;  %s762_s5 = smov [#allocation5]  }
  0x46   : > { %p674_p1 = scmp.ne.s32.totalorder %s894_s16, %s673_s4  ;;  %s677_s7 = sshll.u32 %s762_s5, 4  ;;  %s678_s7 = int_to_ptr.vmem [resolvable:$false] %s677_s7 }
  0x47   : > { %s679_s14 = scalar_lea.vmem %s678_s7, 512  ;;  %p680_p10 = scmp.lt.s32.totalorder %s894_s16, %s678_s7 }
  0x48   : > { %p675_p2 = pnand %p674_p1, %p564_p5  ;;  %p681_p0 = scmp.lt.s32.totalorder %s679_s14, %s673_s4 }
  0x4a   : > { %p676_p9 = pneg %p675_p2  ;;  %p682_p4 = por %p681_p0, %p680_p10 }
  0x4c   : > { %p683_p7 = pnand %p682_p4, %p676_p9 }
  0x4e   : > { %686 = shalt.err (!%p683_p7)
}
  0x4f   : > { %s763_s19 = smov 128   ;;  %s764_s28 = smov 8  }
  0x50   : > { %161 = dma.hbm_to_vmem [thread:$0]  (%p564_p5), %s892_s3, %s881_s6, %s894_s16, %s139_s8, %s763_s19, %s763_s19, %s764_s28  }
  0x51 PF: > { %p568_p3 = scmp.ge.s32.totalorder %s757_s12, 1  ;;  %p163_p8 = scmp.lt.s32.totalorder %s757_s12, 5 }
  0x53   : > { %p164_p11 = pnand %p568_p3, %p163_p8 }
  0x54   : > { %s925_s30 = sand.u32 (!%p164_p11), 1, %s749_s10  }
  0x55   : > { %167 = sbr.rel (%p164_p11) target bundleno = 138 (0x8a), region = 28  ;;  %s569_s17 = sshll.u32 (!%p164_p11), %s925_s30, 7 }
  0x56   : > { %s170_s24 = scalar_lea.sflag (!%p164_p11), [#allocation3], %s925_s30  ;;  %s931_s23 = scalar_lea.vmem (!%p164_p11), [#allocation2], %s569_s17 }
  0x5c   : > { %732 = dma.done.wait (%p827_p6), %s170_s24, 2048  }
  0x5d   : > { %734 = vsyncadd (%p827_p6), %s170_s24, 4294965248  ;;  %s570_s6 = sshll.u32 %s925_s30, 4  ;;  %s179_s8 = scalar_lea.sflag [#allocation6], %s925_s30 }
  0x5e   : > { %s182_s3 = scalar_lea.vmem [#allocation5], %s570_s6 }
  0x5f   : > { %736 = dma.done.wait (%p827_p6), %s179_s8, 256  }
  0x60   : > { %738 = vsyncadd (%p827_p6), %s179_s8, 4294967040  ;;  %v223_v0 = vlaneseq  ;;  %v765_v1 = vmov 1966171168   ;;  %v215_v6 = vld [vmem:[%s182_s3] sm:$0xff]  ;;  %v216_v13 = vld [vmem:[%s182_s3 + $0x8] sm:$0xff]  ;;  %s969_s20 = scalar_lea.vmem [#allocation7], %s569_s17 }
  0x61   : > { %v221_v2 = vunpack.c.l.s4 %v765_v1  ;;  %v219_v9 = vcombine.high %v215_v6, %v215_v6  ;;  %v317_v14 = vld [vmem:[%s931_s23] sm:$0xff]  ;;  %v268_v16 = vcombine.high %v216_v13, %v216_v13  ;;  %v318_v21 = vld [vmem:[%s931_s23 + $0x8] sm:$0xff]  ;;  %v319_v22 = vld [vmem:[%s931_s23 + $0x10] sm:$0xff]  ;;  %s579_s16 = sshll.u32 %s805_s13, 11  ;;  %s459_s25 = sshll.u32 %s969_s20, 4  ;;  %s1015_s25 = int_to_ptr.vmem [resolvable:$true] %s459_s25 }
  0x62   : > { %v224_v3 = vshrl.u32 %v223_v0, 7  ;;  %v321_v31 = vld [vmem:[%s931_s23 + $0x20] sm:$0xff]  ;;  %v320_v32 = vld [vmem:[%s931_s23 + $0x18] sm:$0xff]  ;;  %v322_v41 = vld [vmem:[%s931_s23 + $0x28] sm:$0xff]  ;;  %s1013_s29 = scalar_lea.hbm %s1063_s2, %s579_s16  ;;  %s446_s13 = scalar_lea.sflag [#allocation4], %s925_s30 }
  0x63   : > { %v222_v4 = vunpack.c.0.s8 %v221_v2  ;;  %v325_v36 = vld [vmem:[%s931_s23 + $0x40] sm:$0xff]  ;;  %v323_v42 = vld [vmem:[%s931_s23 + $0x30] sm:$0xff]  ;;  %v326_v48 = vld [vmem:[%s931_s23 + $0x48] sm:$0xff]  ;;  %s687_s4 = scalar_lea.vmem %s1015_s25, 2048  ;;  %p1069_p5 = scmp.ne.s32.totalorder %s1067_s21, 0 }
  0x64   : > { %v946_v8 = vsub.s32 0, %v224_v3  ;;  %v324_v50 = vld [vmem:[%s931_s23 + $0x38] sm:$0xff]  ;;  %v327_v57 = vld [vmem:[%s931_s23 + $0x50] sm:$0xff]  ;;  %v329_v2 = vld [vmem:[%s931_s23 + $0x60] sm:$0xff]  ;;  %p688_p6 = scmp.ne.s32.totalorder %s1015_s25, %s687_s4  ;;  %s766_s5 = smov [#allocation7]  }
  0x65   : > { %v943_v5 = vsub.s32 %v222_v4, %v224_v3  ;;  %v328_v61 = vld [vmem:[%s931_s23 + $0x58] sm:$0xff]  ;;  %s691_s7 = sshll.u32 %s766_s5, 4  ;;  %s692_s7 = int_to_ptr.vmem [resolvable:$false] %s691_s7 }
  0x66   : > { %p689_p12 = pnand %p688_p6, %p1069_p5  ;;  %s693_s14 = scalar_lea.vmem %s692_s7, 4096 }
  0x67   : > { %v226_v7 = vrot.slane %v215_v6, %v943_v5  ;;  %v233_v12 = vrot.slane %v219_v9, %v943_v5  ;;  %v275_v15 = vrot.slane %v216_v13, %v943_v5  ;;  %v282_v26 = vrot.slane %v268_v16, %v943_v5  ;;  %p694_p1 = scmp.lt.s32.totalorder %s1015_s25, %s692_s7  ;;  %p695_p2 = scmp.lt.s32.totalorder %s693_s14, %s687_s4 }
  0x68   : > { %p690_p13 = pneg %p689_p12 }
  0x69   : > { %v242_v10 = vrot.slane %v226_v7, %v943_v5  ;;  %v234_v11 = vcombine.high %v226_v7, %v226_v7  ;;  %v249_v20 = vrot.slane %v233_v12, %v943_v5  ;;  %v235_v23 = vcombine.high %v233_v12, %v233_v12  ;;  %p696_p9 = por %p695_p2, %p694_p1 }
  0x6a   : > { %v291_v24 = vrot.slane %v275_v15, %v943_v5  ;;  %v283_v25 = vcombine.high %v275_v15, %v275_v15  ;;  %v298_v62 = vrot.slane %v282_v26, %v943_v5  ;;  %v284_v63 = vcombine.high %v282_v26, %v282_v26 }
  0x6b   : > { %v336_v17 = vrot.slane %v242_v10, %v946_v8  ;;  %v256_v18 = vrot.slane %v234_v11, %v943_v5  ;;  %v264_v19 = vcombine.high %v242_v10, %v242_v10  ;;  %v352_v33 = vrot.slane %v249_v20, %v946_v8  ;;  %v330_v10 = vld [vmem:[%s931_s23 + $0x68] sm:$0xff]  ;;  %v331_v11 = vld [vmem:[%s931_s23 + $0x70] sm:$0xff]  ;;  %p697_p10 = pnand %p696_p9, %p690_p13 }
  0x6c   : > { %v263_v34 = vrot.slane %v235_v23, %v943_v5  ;;  %v265_v35 = vcombine.high %v249_v20, %v249_v20  ;;  %v368_v37 = vrot.slane %v291_v24, %v946_v8  ;;  %v305_v43 = vrot.slane %v283_v25, %v943_v5 }
  0x6d   : > { %v413_v27 = vadd.f32 %v336_v17, %v317_v14  ;;  %v340_v28 = vrot.slane %v256_v18, %v946_v8  ;;  %v344_v29 = vrot.slane %v264_v19, %v946_v8  ;;  %v266_v30 = vcombine.high %v256_v18, %v256_v18 }
  0x6e   : > { %v417_v44 = vadd.f32 %v352_v33, %v321_v31  ;;  %v356_v45 = vrot.slane %v263_v34, %v946_v8  ;;  %v360_v46 = vrot.slane %v265_v35, %v946_v8  ;;  %v267_v47 = vcombine.high %v263_v34, %v263_v34 }
  0x6f   : > { %429 = vst [vmem:[%s969_s20] sm:$0xff] %v413_v27  ;;  %v414_v38 = vadd.f32 %v340_v28, %v318_v21  ;;  %v415_v39 = vadd.f32 %v344_v29, %v319_v22  ;;  %v348_v40 = vrot.slane %v266_v30, %v946_v8  ;;  %v421_v51 = vadd.f32 %v368_v37, %v325_v36 }
  0x70   : > { %v372_v52 = vrot.slane %v305_v43, %v946_v8  ;;  %v313_v53 = vcombine.high %v291_v24, %v291_v24  ;;  %433 = vst [vmem:[%s969_s20 + $0x20] sm:$0xff] %v417_v44  ;;  %v418_v54 = vadd.f32 %v356_v45, %v322_v41  ;;  %v419_v55 = vadd.f32 %v360_v46, %v323_v42 }
  0x71   : > { %430 = vst [vmem:[%s969_s20 + $0x8] sm:$0xff] %v414_v38  ;;  %431 = vst [vmem:[%s969_s20 + $0x10] sm:$0xff] %v415_v39  ;;  %v416_v49 = vadd.f32 %v348_v40, %v320_v32  ;;  %v364_v56 = vrot.slane %v267_v47, %v946_v8  ;;  %v315_v58 = vcombine.high %v305_v43, %v305_v43 }
  0x72   : > { %437 = vst [vmem:[%s969_s20 + $0x40] sm:$0xff] %v421_v51  ;;  %v422_v59 = vadd.f32 %v372_v52, %v326_v48  ;;  %v376_v60 = vrot.slane %v313_v53, %v946_v8  ;;  %434 = vst [vmem:[%s969_s20 + $0x28] sm:$0xff] %v418_v54  ;;  %v384_v4 = vrot.slane %v298_v62, %v946_v8 }
  0x73   : > { %432 = vst [vmem:[%s969_s20 + $0x18] sm:$0xff] %v416_v49  ;;  %435 = vst [vmem:[%s969_s20 + $0x30] sm:$0xff] %v419_v55  ;;  %v420_v0 = vadd.f32 %v364_v56, %v324_v50  ;;  %v380_v1 = vrot.slane %v315_v58, %v946_v8  ;;  %v312_v6 = vrot.slane %v284_v63, %v943_v5  ;;  %v332_v5 = vld [vmem:[%s931_s23 + $0x78] sm:$0xff] }
  0x74   : > { %438 = vst [vmem:[%s969_s20 + $0x48] sm:$0xff] %v422_v59  ;;  %v423_v3 = vadd.f32 %v376_v60, %v327_v57  ;;  %v314_v7 = vcombine.high %v298_v62, %v298_v62  ;;  %v425_v12 = vadd.f32 %v384_v4, %v329_v2 }
  0x75   : > { %436 = vst [vmem:[%s969_s20 + $0x38] sm:$0xff] %v420_v0  ;;  %v424_v9 = vadd.f32 %v380_v1, %v328_v61  ;;  %v388_v13 = vrot.slane %v312_v6, %v946_v8  ;;  %v316_v15 = vcombine.high %v312_v6, %v312_v6 }
  0x76   : > { %439 = vst [vmem:[%s969_s20 + $0x50] sm:$0xff] %v423_v3  ;;  %v392_v14 = vrot.slane %v314_v7, %v946_v8  ;;  %441 = vst [vmem:[%s969_s20 + $0x60] sm:$0xff] %v425_v12 }
  0x77   : > { %440 = vst [vmem:[%s969_s20 + $0x58] sm:$0xff] %v424_v9  ;;  %v426_v16 = vadd.f32 %v388_v13, %v330_v10  ;;  %v396_v18 = vrot.slane %v316_v15, %v946_v8 }
  0x78   : > { %v427_v17 = vadd.f32 %v392_v14, %v331_v11 }
  0x79   : > { %442 = vst [vmem:[%s969_s20 + $0x68] sm:$0xff] %v426_v16  ;;  %v428_v19 = vadd.f32 %v396_v18, %v332_v5 }
  0x7a   : > { %443 = vst [vmem:[%s969_s20 + $0x70] sm:$0xff] %v427_v17 }
  0x7b   : > { %444 = vst [vmem:[%s969_s20 + $0x78] sm:$0xff] %v428_v19 }
  0x7c   : > { %700 = shalt.err (!%p697_p10)
}
  0x7d   : > { %s701_s19 = scalar_lea.hbm %s1013_s29, 2048  ;;  %s705_s24 = scalar_lea.hbm %s1063_s2, 8192 }
  0x7e   : > { %p702_p0 = scmp.ne.s32.totalorder %s1013_s29, %s701_s19  ;;  %p706_p3 = scmp.lt.u32.totalorder %s1013_s29, %s1063_s2 }
  0x7f   : > { %p707_p8 = scmp.lt.u32.totalorder %s705_s24, %s701_s19  ;;  %p709_p6 = scmp.lt.u32.totalorder %s701_s19, %s1013_s29 }
  0x80   : > { %p703_p4 = pnand %p702_p0, %p1069_p5 }
  0x81   : > { %p708_p11 = por %p707_p8, %p706_p3 }
  0x82   : > { %p704_p7 = pneg %p703_p4 }
  0x83   : > { %p710_p12 = por %p709_p6, %p708_p11 }
  0x85   : > { %p711_p13 = pnand %p710_p12, %p704_p7 }
  0x87   : > { %714 = shalt.err (!%p711_p13)
}
  0x88   : > { %s767_s8 = smov 128   ;;  %s768_s3 = smov 8  }
  0x89   : > { %583 = dma.vmem_to_hbm [thread:$0]  (%p1069_p5), %s1015_s25, 2048, %s1013_s29, %s446_s13, %s767_s8, %s767_s8, %s768_s3  }
  0x8a PF: > { %p589_p1 = scmp.ge.s32.totalorder %s757_s12, 2  ;;  %s474_s20 = sand.u32 1, %s745_s9  }
  0x8b   : > { %p1070_p2 = scmp.ne.s32.totalorder %s1068_s22, 0  ;;  %s475_s16 = scalar_lea.sflag [#allocation4], %s474_s20 }
  0x8d   : > { %p586_p9 = pnand %p589_p1, %p1070_p2 }
  0x8f   : > { %740 = dma.done.wait (!%p586_p9), %s475_s16, 2048  }
  0x90   : > { %742 = vsyncadd (!%p586_p9), %s475_s16, 4294965248  ;;  %p18_p10 = scmp.ge.s32.totalorder %s809_s15, 6   ;;  %s1071_s9 = smov %s749_s10 }
  0x91   : > { %s1072_s10 = smov %s753_s11  ;;  %s1073_s11 = smov %s821_s18 }
  0x92   : > { %s1074_s12 = smov %s809_s15  ;;  %20 = sbr.rel (!%p18_p10) target bundleno = 7 (0x7), region = 86 }
  0x99   :  { %480 = vsyncpa [#allocation3], 1 }
  0x9a   :  { %482 = vsyncpa [#allocation3 + $0x1], 1 }
  0x9b   :  { %483 = vsyncpa [#allocation6], 1 }
  0x9c   :  { %485 = vsyncpa [#allocation6 + $0x1], 1 }
  0x9d   :  { %486 = vsyncpa [#allocation4], 1 }
  0x9e   :  { %488 = vsyncpa [#allocation4 + $0x1], 1 }

</bundles_post_ra>
